<compile_context>
chip_gen: v5e
topology: v5e:2x2
jax: 0.10.0
libtpu: 0.0.40
codegen_flags: <defaults>
</compile_context>

<pallas_src>
import jax
import jax.numpy as jnp
from jax import lax
from jax.experimental import pallas as pl
from jax.experimental.pallas import tpu as pltpu


def patch_encoder_kernel(x_ref, w_ref, b_ref, pe_ref, o_ref):
    # x_ref:  (B, C, N)  patches in their ORIGINAL channels-first torch layout
    # w_ref:  (D, C)     torch Linear weight, untouched (no wrapper transpose)
    # b_ref:  (1, D)     torch Linear bias
    # pe_ref: (N, D)     position embedding table
    # o_ref:  (B, N, D)
    w = w_ref[...]                      # (D, C)
    add_nd = pe_ref[...] + b_ref[...]   # (N, D): bias folded into pos table ONCE, in-kernel (VPU)

    B = x_ref.shape[0]
    for b in range(B):  # B is static and tiny; unrolled
        # out_b[n, d] = sum_c x[b, c, n] * W[d, c]
        # Contract x's channel axis (lhs dim 0) against W's channel axis (rhs dim 1):
        # both operands are consumed in their native layouts; the "transposes" ride the
        # in-kernel MXU/XLU path instead of standalone XLA ops over HBM.
        proj = lax.dot_general(
            x_ref[b], w,
            dimension_numbers=(((0,), (1,)), ((), ())),
            preferred_element_type=jnp.float32,
        )  # (N, D)
        o_ref[b] = (proj + add_nd).astype(o_ref.dtype)


@jax.jit
def patch_encoder(patch_ncn, weight, bias, pos_emb):
    """patch_ncn: (B, C, N) exactly like the PyTorch module input.
    weight: (D, C) torch Linear weight; bias: (D,); pos_emb: (N, D)."""
    B, C, N = patch_ncn.shape
    D = weight.shape[0]

    # (D,) -> (1, D): metadata-only reshape (bitcast); keeps the kernel's bias operand 2D
    # and lane-major without any wrapper compute / HBM round-trip.
    bias2d = bias.reshape(1, D)

    return pl.pallas_call(
        patch_encoder_kernel,
        out_shape=jax.ShapeDtypeStruct((B, N, D), jnp.float32),
        grid=(1,),  # single step: everything VMEM-resident, per-step overhead paid once
        in_specs=[
            pl.BlockSpec((B, C, N), lambda i: (0, 0, 0)),  # x, native layout
            pl.BlockSpec((D, C), lambda i: (0, 0)),        # W, torch layout
            pl.BlockSpec((1, D), lambda i: (0, 0)),        # bias
            pl.BlockSpec((N, D), lambda i: (0, 0)),        # position embedding
        ],
        out_specs=pl.BlockSpec((B, N, D), lambda i: (0, 0, 0)),
        compiler_params=pltpu.CompilerParams(
            dimension_semantics=("arbitrary",)),
    )(patch_ncn, weight, bias2d, pos_emb)


def patch_encoder_ref(patch_ncn, weight, bias, pos_emb):
    x = jnp.transpose(patch_ncn, (0, 2, 1))
    return jnp.einsum("bnc,dc->bnd", x, weight) + bias[None, None, :] + pos_emb[None, :, :]


if __name__ == "__main__":
    # Module constants: image_size=72, patch_size=6 -> num_patches=144, patch_dim=108,
    # projection_dim=64 (patch_dim=108 is hardcoded in nn.Linear(108, ...)).
    B = 2
    PATCH_DIM = 108          # C
    NUM_PATCHES = 144        # N
    PROJ_DIM = 64            # D

    key = jax.random.PRNGKey(0)
    k_x, k_w, k_b, k_pe = jax.random.split(key, 4)

    # deterministic "parameters" (synthetic, not a checkpoint)
    x = jax.random.normal(k_x, (B, PATCH_DIM, NUM_PATCHES), dtype=jnp.float32)
    weight = jax.random.normal(k_w, (PROJ_DIM, PATCH_DIM), dtype=jnp.float32) * 0.05
    bias = jax.random.normal(k_b, (PROJ_DIM,), dtype=jnp.float32) * 0.05
    pos_emb = jax.random.normal(k_pe, (NUM_PATCHES, PROJ_DIM), dtype=jnp.float32) * 0.05

    out = jax.block_until_ready(patch_encoder(x, weight, bias, pos_emb))

    ref = patch_encoder_ref(x, weight, bias, pos_emb)
    assert out.shape == (B, NUM_PATCHES, PROJ_DIM), out.shape
    assert jnp.allclose(out, ref, atol=1e-3, rtol=1e-3), "mismatch vs reference"

    print("KERNEL_OK")
</pallas_src>

<mosaic_0001>
module attributes {stable_mosaic.version = 11 : i64} {
  func.func @patch_encoder_kernel(%arg0: i32, %arg1: memref<2x108x144xf32, #tpu.memory_space<vmem>>, %arg2: memref<64x108xf32, #tpu.memory_space<vmem>>, %arg3: memref<1x64xf32, #tpu.memory_space<vmem>>, %arg4: memref<144x64xf32, #tpu.memory_space<vmem>>, %arg5: memref<2x144x64xf32, #tpu.memory_space<vmem>>) attributes {dimension_semantics = [#tpu.dimension_semantics<arbitrary>], iteration_bounds = array<i64: 1>, scalar_prefetch = 0 : i64, scratch_operands = 0 : i64, tpu.core_type = #tpu.core_type<tc>, window_params = [{pipeline_mode = #tpu.pipeline_mode<synchronous>, transform_indices = @transform_0, window_bounds = array<i64: 2, 108, 144>}, {pipeline_mode = #tpu.pipeline_mode<synchronous>, transform_indices = @transform_1, window_bounds = array<i64: 64, 108>}, {pipeline_mode = #tpu.pipeline_mode<synchronous>, transform_indices = @transform_2, window_bounds = array<i64: 1, 64>}, {pipeline_mode = #tpu.pipeline_mode<synchronous>, transform_indices = @transform_3, window_bounds = array<i64: 144, 64>}, {pipeline_mode = #tpu.pipeline_mode<synchronous>, transform_indices = @transform_4, window_bounds = array<i64: 2, 144, 64>}]} {
    %c0 = arith.constant 0 : index
    %c0_0 = arith.constant 0 : index
    %0 = vector.load %arg2[%c0, %c0_0] : memref<64x108xf32, #tpu.memory_space<vmem>>, vector<64x108xf32>
    %c0_1 = arith.constant 0 : index
    %c0_2 = arith.constant 0 : index
    %1 = vector.load %arg4[%c0_1, %c0_2] : memref<144x64xf32, #tpu.memory_space<vmem>>, vector<144x64xf32>
    %c0_3 = arith.constant 0 : index
    %c0_4 = arith.constant 0 : index
    %2 = vector.load %arg3[%c0_3, %c0_4] : memref<1x64xf32, #tpu.memory_space<vmem>>, vector<1x64xf32>
    %3 = vector.broadcast %2 : vector<1x64xf32> to vector<144x64xf32>
    %4 = arith.addf %1, %3 : vector<144x64xf32>
    %c0_5 = arith.constant 0 : index
    %c0_6 = arith.constant 0 : index
    %c0_7 = arith.constant 0 : index
    %5 = vector.load %arg1[%c0_5, %c0_6, %c0_7] : memref<2x108x144xf32, #tpu.memory_space<vmem>>, vector<1x108x144xf32>
    %6 = vector.shape_cast %5 : vector<1x108x144xf32> to vector<108x144xf32>
    %cst = arith.constant dense<0.000000e+00> : vector<144x64xf32>
    %7 = tpu.matmul %6, %0, %cst {dimension_numbers = #tpu.dot_dimension_numbers<[0], [1], [1], [0], [0, 1, 1, 0], [], []>} : vector<108x144xf32>, vector<64x108xf32>, vector<144x64xf32> -> vector<144x64xf32>
    %8 = arith.addf %7, %4 : vector<144x64xf32>
    %c0_8 = arith.constant 0 : index
    %c0_9 = arith.constant 0 : index
    %c0_10 = arith.constant 0 : index
    %9 = vector.load %arg5[%c0_8, %c0_9, %c0_10] : memref<2x144x64xf32, #tpu.memory_space<vmem>>, vector<1x144x64xf32>
    %10 = vector.shape_cast %9 : vector<1x144x64xf32> to vector<144x64xf32>
    %11 = vector.shape_cast %8 : vector<144x64xf32> to vector<1x144x64xf32>
    tpu.vector_store %arg5[%c0_8, %c0_9, %c0_10], %11 {strides = array<i32>} : memref<2x144x64xf32, #tpu.memory_space<vmem>>, vector<1x144x64xf32>,
    %c1 = arith.constant 1 : index
    %c0_11 = arith.constant 0 : index
    %c0_12 = arith.constant 0 : index
    %12 = vector.load %arg1[%c1, %c0_11, %c0_12] : memref<2x108x144xf32, #tpu.memory_space<vmem>>, vector<1x108x144xf32>
    %13 = vector.shape_cast %12 : vector<1x108x144xf32> to vector<108x144xf32>
    %cst_13 = arith.constant dense<0.000000e+00> : vector<144x64xf32>
    %14 = tpu.matmul %13, %0, %cst_13 {dimension_numbers = #tpu.dot_dimension_numbers<[0], [1], [1], [0], [0, 1, 1, 0], [], []>} : vector<108x144xf32>, vector<64x108xf32>, vector<144x64xf32> -> vector<144x64xf32>
    %15 = arith.addf %14, %4 : vector<144x64xf32>
    %c1_14 = arith.constant 1 : index
    %c0_15 = arith.constant 0 : index
    %c0_16 = arith.constant 0 : index
    %16 = vector.load %arg5[%c1_14, %c0_15, %c0_16] : memref<2x144x64xf32, #tpu.memory_space<vmem>>, vector<1x144x64xf32>
    %17 = vector.shape_cast %16 : vector<1x144x64xf32> to vector<144x64xf32>
    %18 = vector.shape_cast %15 : vector<144x64xf32> to vector<1x144x64xf32>
    tpu.vector_store %arg5[%c1_14, %c0_15, %c0_16], %18 {strides = array<i32>} : memref<2x144x64xf32, #tpu.memory_space<vmem>>, vector<1x144x64xf32>,
    return
  }
  func.func @transform_0(%arg0: i32) -> (i32, i32, i32) {
    %c0_i32 = arith.constant 0 : i32
    %c0_i32_0 = arith.constant 0 : i32
    %c0_i32_1 = arith.constant 0 : i32
    %c0_i32_2 = arith.constant 0 : i32
    return %c0_i32, %c0_i32_0, %c0_i32_1 : i32, i32, i32
  }
  func.func @transform_1(%arg0: i32) -> (i32, i32) {
    %c0_i32 = arith.constant 0 : i32
    %c0_i32_0 = arith.constant 0 : i32
    %c0_i32_1 = arith.constant 0 : i32
    return %c0_i32, %c0_i32_0 : i32, i32
  }
  func.func @transform_2(%arg0: i32) -> (i32, i32) {
    %c0_i32 = arith.constant 0 : i32
    %c0_i32_0 = arith.constant 0 : i32
    %c0_i32_1 = arith.constant 0 : i32
    return %c0_i32, %c0_i32_0 : i32, i32
  }
  func.func @transform_3(%arg0: i32) -> (i32, i32) {
    %c0_i32 = arith.constant 0 : i32
    %c0_i32_0 = arith.constant 0 : i32
    %c0_i32_1 = arith.constant 0 : i32
    return %c0_i32, %c0_i32_0 : i32, i32
  }
  func.func @transform_4(%arg0: i32) -> (i32, i32, i32) {
    %c0_i32 = arith.constant 0 : i32
    %c0_i32_0 = arith.constant 0 : i32
    %c0_i32_1 = arith.constant 0 : i32
    %c0_i32_2 = arith.constant 0 : i32
    return %c0_i32, %c0_i32_0, %c0_i32_1 : i32, i32, i32
  }
}

</mosaic_0001>

<bundles_post_ra>
// kernel: patch_encoder.1
= control target key start
LH: loop header
LB: loop body
LE: loop exit
PB: predicated region body
PF: predicated region fallthrough
CT: control target
= control target key end

     0   :  { %vm157_vm0 = vcmask 883712   ;;  %vm307_vm1 = vcmask 523264   ;;  %s1189_s0 = inlined_call_operand.vmem [shape: f32[2,108,144], index: 0, kind: input, shape index: {}]   ;;  %s1190_s1 = inlined_call_operand.vmem [shape: f32[64,108], index: 1, kind: input, shape index: {}]   ;;  %s1191_s2 = inlined_call_operand.vmem [shape: f32[1,64], index: 2, kind: input, shape index: {}]   ;;  %s1192_s3 = inlined_call_operand.vmem [shape: f32[144,64], index: 3, kind: input, shape index: {}]   ;;  %s1193_s4 = inlined_call_operand.vmem [shape: f32[2,144,64], index: 4, kind: output, shape index: {}]  }
   0x1   :  { %v593_v0 = vld [vmem:[%s1189_s0 + $0xe0] sm:$0xff]  ;;  %v595_v2 = vld [vmem:[%s1189_s0 + $0xf0] sm:$0xff]  ;;  %v24_v26 = vld [vmem:[%s1190_s1 + $0x38] sm:$0xff] }
   0x2   :  { %v65_v1 = vld [vmem:[%s1189_s0] sm:$0xff]  ;;  %355 = vxpose.xlu1.b32.start [1/14] (short) %v593_v0, 128  ;;  %v67_v3 = vld [vmem:[%s1189_s0 + $0x10] sm:$0xff]  ;;  %567 = vmatpush.xpose.msk.msra.mxu0 %vm157_vm0, %v24_v26  ;;  %v66_v30 = vld [vmem:[%s1189_s0 + $0x8] sm:$0xff] }
   0x3   :  { %93 = vxpose.xlu0.b32.start [1/14] (short) %v65_v1, 128  ;;  %v597_v4 = vld [vmem:[%s1189_s0 + $0x100] sm:$0xff]  ;;  %v599_v6 = vld [vmem:[%s1189_s0 + $0x110] sm:$0xff]  ;;  %621 = vmatpush.xpose.msk.msra.mxu1 %vm157_vm0, %v24_v26  ;;  %v22_v31 = vld [vmem:[%s1190_s1 + $0x28] sm:$0xff] }
   0x4   :  { %v69_v5 = vld [vmem:[%s1189_s0 + $0x20] sm:$0xff]  ;;  %v71_v7 = vld [vmem:[%s1189_s0 + $0x30] sm:$0xff]  ;;  %665 = vmatpush.xpose.msk.msra.mxu2 %vm157_vm0, %v24_v26  ;;  %673 = vmatpush.xpose.msk.msra.mxu3 %vm157_vm0, %v24_v26  ;;  %v68_v33 = vld [vmem:[%s1189_s0 + $0x18] sm:$0xff] }
   0x5   :  { %v601_v8 = vld [vmem:[%s1189_s0 + $0x120] sm:$0xff]  ;;  %v603_v10 = vld [vmem:[%s1189_s0 + $0x130] sm:$0xff]  ;;  %125 = vxpose.xlu2.b32.start [1/14] (short) (narrow) %v66_v30, 16  ;;  %v20_v34 = vld [vmem:[%s1190_s1 + $0x18] sm:$0xff] }
   0x6   :  { %v73_v9 = vld [vmem:[%s1189_s0 + $0x40] sm:$0xff]  ;;  %v75_v11 = vld [vmem:[%s1189_s0 + $0x50] sm:$0xff]  ;;  %v70_v36 = vld [vmem:[%s1189_s0 + $0x28] sm:$0xff] }
   0x7   :  { %v605_v12 = vld [vmem:[%s1189_s0 + $0x140] sm:$0xff]  ;;  %v607_v14 = vld [vmem:[%s1189_s0 + $0x150] sm:$0xff]  ;;  %v18_v37 = vld [vmem:[%s1190_s1 + $0x8] sm:$0xff] }
   0x8   :  { %v77_v13 = vld [vmem:[%s1189_s0 + $0x60] sm:$0xff]  ;;  %v79_v15 = vld [vmem:[%s1189_s0 + $0x70] sm:$0xff]  ;;  %v594_v38 = vld [vmem:[%s1189_s0 + $0xe8] sm:$0xff] }
   0x9   :  { %v609_v16 = vld [vmem:[%s1189_s0 + $0x160] sm:$0xff]  ;;  %v611_v18 = vld [vmem:[%s1189_s0 + $0x170] sm:$0xff]  ;;  %v72_v40 = vld [vmem:[%s1189_s0 + $0x38] sm:$0xff] }
   0xa   :  { %356 = vxpose.xlu1.b32.cont [2/14] (short) %v595_v2, 128  ;;  %v81_v17 = vld [vmem:[%s1189_s0 + $0x80] sm:$0xff]  ;;  %v83_v19 = vld [vmem:[%s1189_s0 + $0x90] sm:$0xff]  ;;  %v596_v41 = vld [vmem:[%s1189_s0 + $0xf8] sm:$0xff] }
   0xb   :  { %94 = vxpose.xlu0.b32.cont [2/14] (short) %v67_v3, 128  ;;  %v613_v20 = vld [vmem:[%s1189_s0 + $0x180] sm:$0xff]  ;;  %v615_v22 = vld [vmem:[%s1189_s0 + $0x190] sm:$0xff]  ;;  %v74_v42 = vld [vmem:[%s1189_s0 + $0x48] sm:$0xff] }
   0xc   :  { %v85_v21 = vld [vmem:[%s1189_s0 + $0xa0] sm:$0xff]  ;;  %v87_v23 = vld [vmem:[%s1189_s0 + $0xb0] sm:$0xff]  ;;  %v598_v43 = vld [vmem:[%s1189_s0 + $0x108] sm:$0xff] }
   0xd   :  { %v617_v24 = vld [vmem:[%s1189_s0 + $0x1a0] sm:$0xff]  ;;  %v619_v27 = vld [vmem:[%s1189_s0 + $0x1b0] sm:$0xf]  ;;  %126 = vxpose.xlu2.b32.cont [2/14] (short) (narrow) %v68_v33, 16  ;;  %v76_v44 = vld [vmem:[%s1189_s0 + $0x58] sm:$0xff] }
   0xe   :  { %v89_v25 = vld [vmem:[%s1189_s0 + $0xc0] sm:$0xff]  ;;  %v91_v28 = vld [vmem:[%s1189_s0 + $0xd0] sm:$0xf]  ;;  %v600_v45 = vld [vmem:[%s1189_s0 + $0x118] sm:$0xff] }
   0xf   :  { %v23_v29 = vld [vmem:[%s1190_s1 + $0x30] sm:$0xff]  ;;  %v21_v32 = vld [vmem:[%s1190_s1 + $0x20] sm:$0xff]  ;;  %v78_v46 = vld [vmem:[%s1189_s0 + $0x68] sm:$0xff] }
  0x10   :  { %568 = vmatpush.xpose.msk.msra.mxu0 %vm157_vm0, %v23_v29  ;;  %622 = vmatpush.xpose.msk.msra.mxu1 %vm157_vm0, %v23_v29  ;;  %v19_v35 = vld [vmem:[%s1190_s1 + $0x10] sm:$0xff]  ;;  %v17_v39 = vld [vmem:[%s1190_s1] sm:$0xff]  ;;  %v602_v47 = vld [vmem:[%s1189_s0 + $0x128] sm:$0xff] }
  0x11   :  { %666 = vmatpush.xpose.msk.msra.mxu2 %vm157_vm0, %v23_v29  ;;  %674 = vmatpush.xpose.msk.msra.mxu3 %vm157_vm0, %v23_v29  ;;  %v80_v48 = vld [vmem:[%s1189_s0 + $0x78] sm:$0xff]  ;;  %v82_v52 = vld [vmem:[%s1189_s0 + $0x88] sm:$0xff]  ;;  %v965_v30 = vld [vmem:[%s1191_s2] ss:$0 sm:$0xff] }
  0x12   :  { %357 = vxpose.xlu1.b32.cont [3/14] (short) %v597_v4, 128  ;;  %v604_v51 = vld [vmem:[%s1189_s0 + $0x138] sm:$0xff]  ;;  %v606_v55 = vld [vmem:[%s1189_s0 + $0x148] sm:$0xff]  ;;  %v25_v33 = vld [vmem:[%s1192_s3] sm:$0xff] }
  0x13   :  { %95 = vxpose.xlu0.b32.cont [3/14] (short) %v69_v5, 128  ;;  %v84_v56 = vld [vmem:[%s1189_s0 + $0x98] sm:$0xff]  ;;  %v86_v60 = vld [vmem:[%s1189_s0 + $0xa8] sm:$0xff] }
  0x14   :  { %569 = vmatpush.xpose.msk.msra.mxu0 %vm157_vm0, %v22_v31  ;;  %623 = vmatpush.xpose.msk.msra.mxu1 %vm157_vm0, %v22_v31  ;;  %v608_v59 = vld [vmem:[%s1189_s0 + $0x158] sm:$0xff]  ;;  %v610_v63 = vld [vmem:[%s1189_s0 + $0x168] sm:$0xff] }
  0x15   :  { %667 = vmatpush.xpose.msk.msra.mxu2 %vm157_vm0, %v22_v31  ;;  %675 = vmatpush.xpose.msk.msra.mxu3 %vm157_vm0, %v22_v31  ;;  %v88_v0 = vld [vmem:[%s1189_s0 + $0xb8] sm:$0xff]  ;;  %v90_v4 = vld [vmem:[%s1189_s0 + $0xc8] sm:$0xff] }
  0x16   :  { %127 = vxpose.xlu2.b32.cont [3/14] (short) (narrow) %v70_v36, 16  ;;  %v612_v3 = vld [vmem:[%s1189_s0 + $0x178] sm:$0xff] }
  0x18   :  { %570 = vmatpush.xpose.msk.msra.mxu0 %vm157_vm0, %v21_v32  ;;  %624 = vmatpush.xpose.msk.msra.mxu1 %vm157_vm0, %v21_v32 }
  0x19   :  { %668 = vmatpush.xpose.msk.msra.mxu2 %vm157_vm0, %v21_v32  ;;  %676 = vmatpush.xpose.msk.msra.mxu3 %vm157_vm0, %v21_v32 }
  0x1a   :  { %358 = vxpose.xlu1.b32.cont [4/14] (short) %v599_v6, 128 }
  0x1b   :  { %96 = vxpose.xlu0.b32.cont [4/14] (short) %v71_v7, 128  ;;  %v614_v7 = vld [vmem:[%s1189_s0 + $0x188] sm:$0xff] }
  0x1c   :  { %571 = vmatpush.xpose.msk.msra.mxu0 %vm157_vm0, %v20_v34  ;;  %625 = vmatpush.xpose.msk.msra.mxu1 %vm157_vm0, %v20_v34 }
  0x1d   :  { %669 = vmatpush.xpose.msk.msra.mxu2 %vm157_vm0, %v20_v34  ;;  %677 = vmatpush.xpose.msk.msra.mxu3 %vm157_vm0, %v20_v34  ;;  %v47_v34 = vadd.f32 %v965_v30, %v25_v33 }
  0x1e   :  { %128 = vxpose.xlu2.b32.cont [4/14] (short) (narrow) %v72_v40, 16 }
  0x20   :  { %572 = vmatpush.xpose.msk.msra.mxu0 %vm157_vm0, %v19_v35  ;;  %626 = vmatpush.xpose.msk.msra.mxu1 %vm157_vm0, %v19_v35 }
  0x21   :  { %670 = vmatpush.xpose.msk.msra.mxu2 %vm157_vm0, %v19_v35  ;;  %678 = vmatpush.xpose.msk.msra.mxu3 %vm157_vm0, %v19_v35 }
  0x22   :  { %359 = vxpose.xlu1.b32.cont [5/14] (short) %v601_v8, 128  ;;  %v92_v8 = vld [vmem:[%s1189_s0 + $0xd8] sm:$0xf] }
  0x23   :  { %97 = vxpose.xlu0.b32.cont [5/14] (short) %v73_v9, 128 }
  0x24   :  { %573 = vmatpush.xpose.msk.msra.mxu0 %vm157_vm0, %v18_v37  ;;  %627 = vmatpush.xpose.msk.msra.mxu1 %vm157_vm0, %v18_v37 }
  0x25   :  { %671 = vmatpush.xpose.msk.msra.mxu2 %vm157_vm0, %v18_v37  ;;  %679 = vmatpush.xpose.msk.msra.mxu3 %vm157_vm0, %v18_v37 }
  0x26   :  { %129 = vxpose.xlu2.b32.cont [5/14] (short) (narrow) %v74_v42, 16 }
  0x28   :  { %574 = vmatpush.xpose.msk.msra.mxu0 %vm157_vm0, %v17_v39  ;;  %628 = vmatpush.xpose.msk.msra.mxu1 %vm157_vm0, %v17_v39 }
  0x29   :  { %672 = vmatpush.xpose.msk.msra.mxu2 %vm157_vm0, %v17_v39  ;;  %680 = vmatpush.xpose.msk.msra.mxu3 %vm157_vm0, %v17_v39 }
  0x2a   :  { %360 = vxpose.xlu1.b32.cont [6/14] (short) %v603_v10, 128 }
  0x2b   :  { %98 = vxpose.xlu0.b32.cont [6/14] (short) %v75_v11, 128  ;;  %v616_v11 = vld [vmem:[%s1189_s0 + $0x198] sm:$0xff] }
  0x2e   :  { %130 = vxpose.xlu2.b32.cont [6/14] (short) (narrow) %v76_v44, 16 }
  0x32   :  { %361 = vxpose.xlu1.b32.cont [7/14] (short) %v605_v12, 128 }
  0x33   :  { %99 = vxpose.xlu0.b32.cont [7/14] (short) %v77_v13, 128 }
  0x36   :  { %131 = vxpose.xlu2.b32.cont [7/14] (short) (narrow) %v78_v46, 16 }
  0x3a   :  { %362 = vxpose.xlu1.b32.cont [8/14] (short) %v607_v14, 128  ;;  %v618_v14 = vld [vmem:[%s1189_s0 + $0x1a8] sm:$0xff] }
  0x3b   :  { %100 = vxpose.xlu0.b32.cont [8/14] (short) %v79_v15, 128 }
  0x3e   :  { %132 = vxpose.xlu2.b32.cont [8/14] (short) (narrow) %v80_v48, 16 }
  0x42   :  { %363 = vxpose.xlu1.b32.cont [9/14] (short) %v609_v16, 128 }
  0x43   :  { %101 = vxpose.xlu0.b32.cont [9/14] (short) %v81_v17, 128  ;;  %v620_v17 = vld [vmem:[%s1189_s0 + $0x1b8] sm:$0xf] }
  0x46   :  { %133 = vxpose.xlu2.b32.cont [9/14] (short) (narrow) %v82_v52, 16 }
  0x4a   :  { %364 = vxpose.xlu1.b32.cont [10/14] (short) %v611_v18, 128 }
  0x4b   :  { %102 = vxpose.xlu0.b32.cont [10/14] (short) %v83_v19, 128 }
  0x4e   :  { %134 = vxpose.xlu2.b32.cont [10/14] (short) (narrow) %v84_v56, 16 }
  0x52   :  { %365 = vxpose.xlu1.b32.cont [11/14] (short) %v613_v20, 128 }
  0x53   :  { %103 = vxpose.xlu0.b32.cont [11/14] (short) %v85_v21, 128 }
  0x56   :  { %135 = vxpose.xlu2.b32.cont [11/14] (short) (narrow) %v86_v60, 16 }
  0x5a   :  { %366 = vxpose.xlu1.b32.cont [12/14] (short) %v615_v22, 128 }
  0x5b   :  { %104 = vxpose.xlu0.b32.cont [12/14] (short) %v87_v23, 128 }
  0x5e   :  { %136 = vxpose.xlu2.b32.cont [12/14] (short) (narrow) %v88_v0, 16 }
  0x62   :  { %367 = vxpose.xlu1.b32.cont [13/14] (short) %v617_v24, 128 }
  0x63   :  { %105 = vxpose.xlu0.b32.cont [13/14] (short) %v89_v25, 128 }
  0x66   :  { %137 = vxpose.xlu2.b32.cont [13/14] (short) (narrow) %v90_v4, 16 }
  0x6a   :  { %368 = vxpose.xlu1.b32.end [14/14] (short) %v619_v27, 128 }
  0x6b   :  { %106 = vxpose.xlu0.b32.end [14/14] (short) %v91_v28, 128 }
  0x6e   :  { %138 = vxpose.xlu2.b32.end [14/14] (short) (narrow) %v92_v8, 16 }
  0x83   :  { %387 = vxpose.xlu0.b32.start [1/14] (short) (narrow) %v594_v38, 16 }
  0x8b   :  { %388 = vxpose.xlu0.b32.cont [2/14] (short) (narrow) %v596_v41, 16  ;;  %v26_v41 = vld [vmem:[%s1192_s3 + $0x8] sm:$0xff] }
  0x8c   :  { %v48_v42 = vadd.f32 %v965_v30, %v26_v41 }
  0x93   :  { %389 = vxpose.xlu0.b32.cont [3/14] (short) (narrow) %v598_v43, 16 }
  0x9b   :  { %390 = vxpose.xlu0.b32.cont [4/14] (short) (narrow) %v600_v45, 16 }
  0x9f   :  { %v141_v35 = vpop.trf.xlu2 }
  0xa3   :  { %391 = vxpose.xlu0.b32.cont [5/14] (short) (narrow) %v602_v47, 16 }
  0xa6   :  { %v371_v49 = vpop.trf.xlu1 }
  0xa7   :  { %v109_v50 = vpop.trf.xlu0  ;;  %629 = vmatmul.msk.f32.vlgmr.msra.gmra.mxu1 %vm157_vm0, %v371_v49  ;;  %v142_v43 = vpop.trf.xlu2  ;;  %v27_v49 = vld [vmem:[%s1192_s3 + $0x10] sm:$0xff] }
  0xa8   :  { %575 = vmatmul.msk.f32.vlgmr.msra.gmra.mxu0 %vm157_vm0, %v109_v50  ;;  %v49_v50 = vadd.f32 %v965_v30, %v27_v49 }
  0xab   :  { %392 = vxpose.xlu0.b32.cont [6/14] (short) (narrow) %v604_v51, 16 }
  0xae   :  { %v372_v53 = vpop.trf.xlu1 }
  0xaf   :  { %v110_v54 = vpop.trf.xlu0  ;;  %630 = vmatmul.msk.f32.gmra.mxu1 %vm157_vm0, %v372_v53 }
  0xb0   :  { %576 = vmatmul.msk.f32.gmra.mxu0 %vm157_vm0, %v110_v54 }
  0xb3   :  { %393 = vxpose.xlu0.b32.cont [7/14] (short) (narrow) %v606_v55, 16  ;;  %v28_v55 = vld [vmem:[%s1192_s3 + $0x18] sm:$0xff] }
  0xb4   :  { %v50_v56 = vadd.f32 %v965_v30, %v28_v55 }
  0xb6   :  { %v373_v57 = vpop.trf.xlu1 }
  0xb7   :  { %v111_v58 = vpop.trf.xlu0  ;;  %631 = vmatmul.msk.f32.gmra.mxu1 %vm157_vm0, %v373_v57 }
  0xb8   :  { %577 = vmatmul.msk.f32.gmra.mxu0 %vm157_vm0, %v111_v58 }
  0xbb   :  { %394 = vxpose.xlu0.b32.cont [8/14] (short) (narrow) %v608_v59, 16 }
  0xbe   :  { %v374_v61 = vpop.trf.xlu1 }
  0xbf   :  { %v112_v62 = vpop.trf.xlu0  ;;  %632 = vmatmul.msk.f32.gmra.mxu1 %vm157_vm0, %v374_v61  ;;  %v29_v61 = vld [vmem:[%s1192_s3 + $0x20] sm:$0xff] }
  0xc0   :  { %578 = vmatmul.msk.f32.gmra.mxu0 %vm157_vm0, %v112_v62  ;;  %v51_v62 = vadd.f32 %v965_v30, %v29_v61 }
  0xc3   :  { %395 = vxpose.xlu0.b32.cont [9/14] (short) (narrow) %v610_v63, 16 }
  0xc6   :  { %v375_v1 = vpop.trf.xlu1 }
  0xc7   :  { %v113_v2 = vpop.trf.xlu0  ;;  %633 = vmatmul.msk.f32.gmra.mxu1 %vm157_vm0, %v375_v1 }
  0xc8   :  { %579 = vmatmul.msk.f32.gmra.mxu0 %vm157_vm0, %v113_v2 }
  0xcb   :  { %396 = vxpose.xlu0.b32.cont [10/14] (short) (narrow) %v612_v3, 16  ;;  %v30_v3 = vld [vmem:[%s1192_s3 + $0x28] sm:$0xff] }
  0xcc   :  { %v52_v4 = vadd.f32 %v965_v30, %v30_v3 }
  0xce   :  { %v376_v5 = vpop.trf.xlu1 }
  0xcf   :  { %v114_v6 = vpop.trf.xlu0  ;;  %634 = vmatmul.msk.f32.gmra.mxu1 %vm157_vm0, %v376_v5 }
  0xd0   :  { %580 = vmatmul.msk.f32.gmra.mxu0 %vm157_vm0, %v114_v6 }
  0xd3   :  { %397 = vxpose.xlu0.b32.cont [11/14] (short) (narrow) %v614_v7, 16 }
  0xd6   :  { %v377_v9 = vpop.trf.xlu1 }
  0xd7   :  { %v115_v10 = vpop.trf.xlu0  ;;  %635 = vmatmul.msk.f32.gmra.mxu1 %vm157_vm0, %v377_v9  ;;  %v31_v9 = vld [vmem:[%s1192_s3 + $0x30] sm:$0xff] }
  0xd8   :  { %581 = vmatmul.msk.f32.gmra.mxu0 %vm157_vm0, %v115_v10  ;;  %v53_v10 = vadd.f32 %v965_v30, %v31_v9 }
  0xdb   :  { %398 = vxpose.xlu0.b32.cont [12/14] (short) (narrow) %v616_v11, 16 }
  0xde   :  { %v378_v12 = vpop.trf.xlu1 }
  0xdf   :  { %v116_v13 = vpop.trf.xlu0  ;;  %636 = vmatmul.msk.f32.gmra.mxu1 %vm157_vm0, %v378_v12 }
  0xe0   :  { %582 = vmatmul.msk.f32.gmra.mxu0 %vm157_vm0, %v116_v13 }
  0xe3   :  { %399 = vxpose.xlu0.b32.cont [13/14] (short) (narrow) %v618_v14, 16 }
  0xe6   :  { %v379_v15 = vpop.trf.xlu1 }
  0xe7   :  { %v117_v16 = vpop.trf.xlu0  ;;  %637 = vmatmul.msk.f32.gmra.mxu1 %vm157_vm0, %v379_v15  ;;  %v32_v15 = vld [vmem:[%s1192_s3 + $0x38] sm:$0xff] }
  0xe8   :  { %583 = vmatmul.msk.f32.gmra.mxu0 %vm157_vm0, %v117_v16  ;;  %v54_v16 = vadd.f32 %v965_v30, %v32_v15 }
  0xeb   :  { %400 = vxpose.xlu0.b32.end [14/14] (short) (narrow) %v620_v17, 16 }
  0xee   :  { %v380_v18 = vpop.trf.xlu1 }
  0xef   :  { %v118_v19 = vpop.trf.xlu0  ;;  %638 = vmatmul.msk.f32.vlgmr.msra.gmra.mxu3 %vm157_vm0, %v380_v18 }
  0xf0   :  { %584 = vmatmul.msk.f32.vlgmr.msra.gmra.mxu2 %vm157_vm0, %v118_v19 }
  0xf6   :  { %v381_v20 = vpop.trf.xlu1 }
  0xf7   :  { %v119_v21 = vpop.trf.xlu0  ;;  %639 = vmatmul.msk.f32.gmra.mxu3 %vm157_vm0, %v381_v20 }
  0xf8   :  { %585 = vmatmul.msk.f32.gmra.mxu2 %vm157_vm0, %v119_v21  ;;  %v33_v21 = vld [vmem:[%s1192_s3 + $0x40] sm:$0xff] }
  0xfe   :  { %v382_v22 = vpop.trf.xlu1 }
  0xff   :  { %v120_v23 = vpop.trf.xlu0  ;;  %640 = vmatmul.msk.f32.gmra.mxu3 %vm157_vm0, %v382_v22  ;;  %v55_v22 = vadd.f32 %v965_v30, %v33_v21 }
 0x100   :  { %586 = vmatmul.msk.f32.gmra.mxu2 %vm157_vm0, %v120_v23 }
 0x106   :  { %v383_v24 = vpop.trf.xlu1 }
 0x107   :  { %v121_v25 = vpop.trf.xlu0  ;;  %641 = vmatmul.msk.f32.gmra.mxu3 %vm157_vm0, %v383_v24 }
 0x108   :  { %587 = vmatmul.msk.f32.gmra.mxu2 %vm157_vm0, %v121_v25 }
 0x10e   :  { %v384_v26 = vpop.trf.xlu1 }
 0x10f   :  { %v122_v27 = vpop.trf.xlu0  ;;  %642 = vmatmul.msk.f32.gmra.mxu3 %vm157_vm0, %v384_v26 }
 0x110   :  { %588 = vmatmul.msk.f32.gmra.mxu2 %vm157_vm0, %v122_v27  ;;  %v34_v27 = vld [vmem:[%s1192_s3 + $0x48] sm:$0xff] }
 0x116   :  { %v385_v28 = vpop.trf.xlu1 }
 0x117   :  { %v123_v29 = vpop.trf.xlu0  ;;  %643 = vmatmul.msk.f32.gmra.mxu3 %vm157_vm0, %v385_v28  ;;  %v56_v28 = vadd.f32 %v965_v30, %v34_v27 }
 0x118   :  { %589 = vmatmul.msk.f32.gmra.mxu2 %vm157_vm0, %v123_v29 }
 0x11e   :  { %v386_v31 = vpop.trf.xlu1 }
 0x11f   :  { %v124_v32 = vpop.trf.xlu0  ;;  %644 = vmatmul.msk.f32.gmra.mxu3 %vm157_vm0, %v386_v31 }
 0x120   :  { %590 = vmatmul.msk.f32.gmra.mxu2 %vm157_vm0, %v124_v32 }
 0x124   :  { %v490_v37 = vpop.f32.mrf.mxu1 }
 0x125   :  { %v253_v36 = vpop.f32.mrf.mxu0  ;;  %v491_v39 = vadd.f32 %v490_v37, %v47_v34 }
 0x126   :  { %v254_v38 = vadd.f32 %v253_v36, %v47_v34  ;;  %v35_v34 = vld [vmem:[%s1192_s3 + $0x50] sm:$0xff] }
 0x127   :  { %v403_v40 = vpop.trf.xlu0  ;;  %647 = vst.msk [vmem:[%s1193_s4 + $0x90] sm:$0xff] %vm307_vm1, %v491_v39 }
 0x128   :  { %308 = vst.msk [vmem:[%s1193_s4] sm:$0xff] %vm307_vm1, %v254_v38  ;;  %591 = vmatmul.msk.f32.gmra.mxu2 %vm157_vm0, %v141_v35  ;;  %645 = vmatmul.msk.f32.gmra.mxu3 %vm157_vm0, %v403_v40  ;;  %v57_v35 = vadd.f32 %v965_v30, %v35_v34  ;;  %v36_v40 = vld [vmem:[%s1192_s3 + $0x58] sm:$0xff] }
 0x129   :  { %v58_v41 = vadd.f32 %v965_v30, %v36_v40 }
 0x12c   :  { %v493_v45 = vpop.f32.mrf.mxu1 }
 0x12d   :  { %v256_v44 = vpop.f32.mrf.mxu0  ;;  %v494_v47 = vadd.f32 %v493_v45, %v48_v42 }
 0x12e   :  { %v257_v46 = vadd.f32 %v256_v44, %v48_v42 }
 0x12f   :  { %v404_v48 = vpop.trf.xlu0  ;;  %648 = vst.msk [vmem:[%s1193_s4 + $0x98] sm:$0xff] %vm307_vm1, %v494_v47 }
 0x130   :  { %309 = vst.msk [vmem:[%s1193_s4 + $0x8] sm:$0xff] %vm307_vm1, %v257_v46  ;;  %592 = vmatmul.msk.f32.gmra.mxu2 %vm157_vm0, %v142_v43  ;;  %646 = vmatmul.msk.f32.gmra.mxu3 %vm157_vm0, %v404_v48  ;;  %v37_v46 = vld [vmem:[%s1192_s3 + $0x60] sm:$0xff] }
 0x131   :  { %v59_v47 = vadd.f32 %v965_v30, %v37_v46 }
 0x134   :  { %v496_v52 = vpop.f32.mrf.mxu1 }
 0x135   :  { %v259_v51 = vpop.f32.mrf.mxu0  ;;  %v497_v54 = vadd.f32 %v496_v52, %v49_v50  ;;  %v38_v52 = vld [vmem:[%s1192_s3 + $0x68] sm:$0xff] }
 0x136   :  { %v260_v53 = vadd.f32 %v259_v51, %v49_v50 }
 0x137   :  { %649 = vst.msk [vmem:[%s1193_s4 + $0xa0] sm:$0xff] %vm307_vm1, %v497_v54 }
 0x138   :  { %310 = vst.msk [vmem:[%s1193_s4 + $0x10] sm:$0xff] %vm307_vm1, %v260_v53  ;;  %v60_v53 = vadd.f32 %v965_v30, %v38_v52 }
 0x13c   :  { %v499_v58 = vpop.f32.mrf.mxu1 }
 0x13d   :  { %v262_v57 = vpop.f32.mrf.mxu0  ;;  %v500_v60 = vadd.f32 %v499_v58, %v50_v56  ;;  %v39_v58 = vld [vmem:[%s1192_s3 + $0x70] sm:$0xff] }
 0x13e   :  { %v263_v59 = vadd.f32 %v262_v57, %v50_v56 }
 0x13f   :  { %650 = vst.msk [vmem:[%s1193_s4 + $0xa8] sm:$0xff] %vm307_vm1, %v500_v60 }
 0x140   :  { %311 = vst.msk [vmem:[%s1193_s4 + $0x18] sm:$0xff] %vm307_vm1, %v263_v59  ;;  %v61_v59 = vadd.f32 %v965_v30, %v39_v58 }
 0x144   :  { %v502_v0 = vpop.f32.mrf.mxu1 }
 0x145   :  { %v265_v63 = vpop.f32.mrf.mxu0  ;;  %v503_v2 = vadd.f32 %v502_v0, %v51_v62  ;;  %v40_v0 = vld [vmem:[%s1192_s3 + $0x78] sm:$0xff] }
 0x146   :  { %v266_v1 = vadd.f32 %v265_v63, %v51_v62 }
 0x147   :  { %651 = vst.msk [vmem:[%s1193_s4 + $0xb0] sm:$0xff] %vm307_vm1, %v503_v2 }
 0x148   :  { %312 = vst.msk [vmem:[%s1193_s4 + $0x20] sm:$0xff] %vm307_vm1, %v266_v1  ;;  %v62_v1 = vadd.f32 %v965_v30, %v40_v0 }
 0x14c   :  { %v505_v6 = vpop.f32.mrf.mxu1 }
 0x14d   :  { %v268_v5 = vpop.f32.mrf.mxu0  ;;  %v506_v8 = vadd.f32 %v505_v6, %v52_v4  ;;  %v41_v6 = vld [vmem:[%s1192_s3 + $0x80] sm:$0xff] }
 0x14e   :  { %v269_v7 = vadd.f32 %v268_v5, %v52_v4 }
 0x14f   :  { %652 = vst.msk [vmem:[%s1193_s4 + $0xb8] sm:$0xff] %vm307_vm1, %v506_v8 }
 0x150   :  { %313 = vst.msk [vmem:[%s1193_s4 + $0x28] sm:$0xff] %vm307_vm1, %v269_v7  ;;  %v63_v7 = vadd.f32 %v965_v30, %v41_v6 }
 0x154   :  { %v508_v12 = vpop.f32.mrf.mxu1 }
 0x155   :  { %v271_v11 = vpop.f32.mrf.mxu0  ;;  %v509_v14 = vadd.f32 %v508_v12, %v53_v10  ;;  %v42_v12 = vld [vmem:[%s1192_s3 + $0x88] sm:$0xff] }
 0x156   :  { %v272_v13 = vadd.f32 %v271_v11, %v53_v10 }
 0x157   :  { %653 = vst.msk [vmem:[%s1193_s4 + $0xc0] sm:$0xff] %vm307_vm1, %v509_v14 }
 0x158   :  { %314 = vst.msk [vmem:[%s1193_s4 + $0x30] sm:$0xff] %vm307_vm1, %v272_v13  ;;  %v64_v13 = vadd.f32 %v965_v30, %v42_v12 }
 0x15c   :  { %v511_v18 = vpop.f32.mrf.mxu1 }
 0x15d   :  { %v274_v17 = vpop.f32.mrf.mxu0  ;;  %v512_v20 = vadd.f32 %v511_v18, %v54_v16 }
 0x15e   :  { %v275_v19 = vadd.f32 %v274_v17, %v54_v16 }
 0x15f   :  { %654 = vst.msk [vmem:[%s1193_s4 + $0xc8] sm:$0xff] %vm307_vm1, %v512_v20 }
 0x160   :  { %315 = vst.msk [vmem:[%s1193_s4 + $0x38] sm:$0xff] %vm307_vm1, %v275_v19 }
 0x164   :  { %v514_v24 = vpop.f32.mrf.mxu1 }
 0x165   :  { %v277_v23 = vpop.f32.mrf.mxu0  ;;  %v515_v26 = vadd.f32 %v514_v24, %v55_v22 }
 0x166   :  { %v278_v25 = vadd.f32 %v277_v23, %v55_v22 }
 0x167   :  { %655 = vst.msk [vmem:[%s1193_s4 + $0xd0] sm:$0xff] %vm307_vm1, %v515_v26 }
 0x168   :  { %316 = vst.msk [vmem:[%s1193_s4 + $0x40] sm:$0xff] %vm307_vm1, %v278_v25 }
 0x172   :  { %v517_v31 = vpop.f32.mrf.mxu3 }
 0x173   :  { %v280_v29 = vpop.f32.mrf.mxu2  ;;  %v518_v33 = vadd.f32 %v517_v31, %v56_v28 }
 0x174   :  { %v281_v32 = vadd.f32 %v280_v29, %v56_v28 }
 0x175   :  { %656 = vst.msk [vmem:[%s1193_s4 + $0xd8] sm:$0xff] %vm307_vm1, %v518_v33 }
 0x176   :  { %317 = vst.msk [vmem:[%s1193_s4 + $0x48] sm:$0xff] %vm307_vm1, %v281_v32 }
 0x17a   :  { %v520_v37 = vpop.f32.mrf.mxu3 }
 0x17b   :  { %v283_v36 = vpop.f32.mrf.mxu2  ;;  %v521_v39 = vadd.f32 %v520_v37, %v57_v35 }
 0x17c   :  { %v284_v38 = vadd.f32 %v283_v36, %v57_v35 }
 0x17d   :  { %657 = vst.msk [vmem:[%s1193_s4 + $0xe0] sm:$0xff] %vm307_vm1, %v521_v39 }
 0x17e   :  { %318 = vst.msk [vmem:[%s1193_s4 + $0x50] sm:$0xff] %vm307_vm1, %v284_v38 }
 0x182   :  { %v523_v43 = vpop.f32.mrf.mxu3 }
 0x183   :  { %v286_v42 = vpop.f32.mrf.mxu2  ;;  %v524_v45 = vadd.f32 %v523_v43, %v58_v41 }
 0x184   :  { %v287_v44 = vadd.f32 %v286_v42, %v58_v41 }
 0x185   :  { %658 = vst.msk [vmem:[%s1193_s4 + $0xe8] sm:$0xff] %vm307_vm1, %v524_v45 }
 0x186   :  { %319 = vst.msk [vmem:[%s1193_s4 + $0x58] sm:$0xff] %vm307_vm1, %v287_v44 }
 0x18a   :  { %v526_v49 = vpop.f32.mrf.mxu3 }
 0x18b   :  { %v289_v48 = vpop.f32.mrf.mxu2  ;;  %v527_v51 = vadd.f32 %v526_v49, %v59_v47 }
 0x18c   :  { %v290_v50 = vadd.f32 %v289_v48, %v59_v47 }
 0x18d   :  { %659 = vst.msk [vmem:[%s1193_s4 + $0xf0] sm:$0xff] %vm307_vm1, %v527_v51 }
 0x18e   :  { %320 = vst.msk [vmem:[%s1193_s4 + $0x60] sm:$0xff] %vm307_vm1, %v290_v50 }
 0x192   :  { %v529_v55 = vpop.f32.mrf.mxu3 }
 0x193   :  { %v292_v54 = vpop.f32.mrf.mxu2  ;;  %v530_v57 = vadd.f32 %v529_v55, %v60_v53 }
 0x194   :  { %v293_v56 = vadd.f32 %v292_v54, %v60_v53 }
 0x195   :  { %660 = vst.msk [vmem:[%s1193_s4 + $0xf8] sm:$0xff] %vm307_vm1, %v530_v57 }
 0x196   :  { %321 = vst.msk [vmem:[%s1193_s4 + $0x68] sm:$0xff] %vm307_vm1, %v293_v56 }
 0x19a   :  { %v532_v61 = vpop.f32.mrf.mxu3 }
 0x19b   :  { %v295_v60 = vpop.f32.mrf.mxu2  ;;  %v533_v63 = vadd.f32 %v532_v61, %v61_v59 }
 0x19c   :  { %v296_v62 = vadd.f32 %v295_v60, %v61_v59 }
 0x19d   :  { %661 = vst.msk [vmem:[%s1193_s4 + $0x100] sm:$0xff] %vm307_vm1, %v533_v63 }
 0x19e   :  { %322 = vst.msk [vmem:[%s1193_s4 + $0x70] sm:$0xff] %vm307_vm1, %v296_v62 }
 0x1a2   :  { %v535_v3 = vpop.f32.mrf.mxu3 }
 0x1a3   :  { %v298_v2 = vpop.f32.mrf.mxu2  ;;  %v536_v5 = vadd.f32 %v535_v3, %v62_v1 }
 0x1a4   :  { %v299_v4 = vadd.f32 %v298_v2, %v62_v1 }
 0x1a5   :  { %662 = vst.msk [vmem:[%s1193_s4 + $0x108] sm:$0xff] %vm307_vm1, %v536_v5 }
 0x1a6   :  { %323 = vst.msk [vmem:[%s1193_s4 + $0x78] sm:$0xff] %vm307_vm1, %v299_v4 }
 0x1ab   :  { %v301_v8 = vpop.f32.mrf.mxu2  ;;  %v538_v9 = vpop.f32.mrf.mxu3 }
 0x1ac   :  { %v302_v10 = vadd.f32 %v301_v8, %v63_v7  ;;  %v539_v11 = vadd.f32 %v538_v9, %v63_v7 }
 0x1ae   :  { %324 = vst.msk [vmem:[%s1193_s4 + $0x80] sm:$0xff] %vm307_vm1, %v302_v10 }
 0x1af   :  { %663 = vst.msk [vmem:[%s1193_s4 + $0x110] sm:$0xff] %vm307_vm1, %v539_v11 }
 0x1b3   :  { %v304_v14 = vpop.f32.mrf.mxu2  ;;  %v541_v15 = vpop.f32.mrf.mxu3 }
 0x1b4   :  { %v305_v16 = vadd.f32 %v304_v14, %v64_v13  ;;  %v542_v17 = vadd.f32 %v541_v15, %v64_v13 }
 0x1b6   :  { %325 = vst.msk [vmem:[%s1193_s4 + $0x88] sm:$0xff] %vm307_vm1, %v305_v16 }
 0x1b7   :  { %664 = vst.msk [vmem:[%s1193_s4 + $0x118] sm:$0xff] %vm307_vm1, %v542_v17 }

</bundles_post_ra>
